<compile_context>
chip_gen: v5e
topology: v5e:2x2
jax: 0.10.0
libtpu: 0.0.40
codegen_flags: <defaults>
</compile_context>

<pallas_src>
import functools

import jax
import jax.numpy as jnp
from jax.experimental import pallas as pl
from jax.experimental.pallas import tpu as pltpu


def _round_up(x, m):
    return (x + m - 1) // m * m


# ---------------------------------------------------------------------------
# Pallas kernel: 2-layer 1x1-conv MLP + max-pool over nsample + idx_cnt mask
# ---------------------------------------------------------------------------
def _grouped_mlp_pool_kernel(x_ref, mask_ref, w1_ref, w2_ref, b2_ref, o_ref,
                             *, nsample, tile_m):
    # x_ref   : (Cin_pad, nsample*TM) bf16  grouped features, k-major slabs of TM lanes
    #           (last input channel is a constant 1.0 carrying the folded bias b1)
    # mask_ref: (1, TM) f32                 (idx_cnt > 0) mask
    # w1_ref  : (H, Cin_pad) bf16           b1 folded into the ones-channel column
    # w2_ref  : (Cout, H) bf16
    # b2_ref  : (Cout, 1) f32
    # o_ref   : (Cout, TM) bf16             max-pooled features
    #
    # Layer 1: one wide matmul over all nsample*TM lanes (weights stationary in MXU).
    h = jnp.dot(w1_ref[...], x_ref[...],
                preferred_element_type=jnp.float32)            # (H, K*TM) f32
    h = jnp.maximum(h, 0.0).astype(w2_ref.dtype)               # ReLU, single cast to bf16
    # Layer 2: second wide matmul, bias deferred to after the pool.
    y = jnp.dot(w2_ref[...], h,
                preferred_element_type=jnp.float32)            # (Cout, K*TM) f32

    # Max-pool over nsample: running maximum over static, 128-aligned lane slabs.
    pooled = y[:, 0:tile_m]
    for kk in range(1, nsample):
        pooled = jnp.maximum(pooled, y[:, kk * tile_m:(kk + 1) * tile_m])

    # +b2 and ReLU commute exactly with the max (b2 identical across k; ReLU monotone),
    # and the {0,1} mask commutes with the max as well, so applying them after the
    # pool is exact and touches only (Cout, TM) instead of (Cout, K*TM).
    pooled = jnp.maximum(pooled + b2_ref[...], 0.0)
    o_ref[...] = (pooled * mask_ref[...]).astype(o_ref.dtype)


def grouped_mlp_maxpool(grouped_cmk, mask, w1, b1, w2, b2, *,
                        max_tile_m=2048, min_grid=2, compute_dtype=jnp.bfloat16):
    """grouped_cmk: (Cin, M, nsample) channels-first; mask: (1, M).

    Returns pooled features (Cout, M) in `compute_dtype` (bf16 writeback).
    """
    cin, m, ns = grouped_cmk.shape
    h_dim, cin_w = w1.shape
    assert cin_w == cin and w2.shape[1] == h_dim
    cout = w2.shape[0]

    # --- fold b1 into a constant ones channel, pad Cin to a multiple of 8 ----------
    cin_pad = _round_up(cin + 1, 8)
    parts = [grouped_cmk, jnp.ones((1, m, ns), grouped_cmk.dtype)]
    if cin_pad > cin + 1:
        parts.append(jnp.zeros((cin_pad - cin - 1, m, ns), grouped_cmk.dtype))
    x = jnp.concatenate(parts, axis=0).astype(compute_dtype)          # (Cin_pad, M, ns)
    w1p = jnp.concatenate(
        [w1, b1.reshape(h_dim, 1),
         jnp.zeros((h_dim, cin_pad - cin - 1), w1.dtype)], axis=1)    # (H, Cin_pad)

    # --- lane tiling: pad M only to 128, divisor-friendly tile, >=2 steps for v7x --
    m128 = _round_up(m, 128)
    n_steps = max(pl.cdiv(m128, max_tile_m), min_grid if m128 >= 256 else 1)
    tile_m = _round_up(pl.cdiv(m128, n_steps), 128)
    n_tiles = pl.cdiv(m128, tile_m)
    m_pad = n_tiles * tile_m

    x = jnp.pad(x, ((0, 0), (0, m_pad - m), (0, 0)))
    mask = jnp.pad(mask.astype(jnp.float32), ((0, 0), (0, m_pad - m)))

    # k-slab layout: (Cin_pad, n_tiles, ns, TM) -> (Cin_pad, n_tiles*ns*TM) so every
    # grid step sees one contiguous, lane-dense (Cin_pad, ns*TM) block (k-major).
    x = (x.reshape(cin_pad, n_tiles, tile_m, ns)
           .transpose(0, 1, 3, 2)
           .reshape(cin_pad, n_tiles * ns * tile_m))
    # TODO(synk): at realistic N, fuse the neighbour gather + this relayout into the
    # kernel via PrefetchScalarGridSpec (idx table in SMEM + manual make_async_copy)
    # so the nsample-amplified tensor never round-trips HBM outside the kernel.

    kernel = functools.partial(_grouped_mlp_pool_kernel, nsample=ns, tile_m=tile_m)
    out = pl.pallas_call(
        kernel,
        out_shape=jax.ShapeDtypeStruct((cout, m_pad), compute_dtype),
        grid=(n_tiles,),
        in_specs=[
            pl.BlockSpec((cin_pad, ns * tile_m), lambda i: (0, i)),
            pl.BlockSpec((1, tile_m), lambda i: (0, i)),
            pl.BlockSpec((h_dim, cin_pad), lambda i: (0, 0)),
            pl.BlockSpec((cout, h_dim), lambda i: (0, 0)),
            pl.BlockSpec((cout, 1), lambda i: (0, 0)),
        ],
        out_specs=pl.BlockSpec((cout, tile_m), lambda i: (0, i)),
        compiler_params=pltpu.CompilerParams(dimension_semantics=("parallel",)),
    )(x, mask,
      w1p.astype(compute_dtype),
      w2.astype(compute_dtype),
      b2.reshape(cout, 1).astype(jnp.float32))
    return out[:, :m]


# ---------------------------------------------------------------------------
# Plain-JAX glue: d-FPS, ball query, channels-first grouping
# ---------------------------------------------------------------------------
def furthest_point_sample(xyz, npoint):
    """xyz: (B, N, 3) -> (B, npoint) int32.  Matches the CUDA d-fps (starts at 0)."""
    b, n, _ = xyz.shape

    def body(i, state):
        idx, dists, far = state
        idx = idx.at[:, i].set(far)
        centroid = jnp.take_along_axis(xyz, far[:, None, None].astype(jnp.int32), axis=1)
        d = jnp.sum((xyz - centroid) ** 2, axis=-1)
        dists = jnp.minimum(dists, d)
        far = jnp.argmax(dists, axis=-1).astype(jnp.int32)
        return idx, dists, far

    init = (jnp.zeros((b, npoint), jnp.int32),
            jnp.full((b, n), 1e10, jnp.float32),
            jnp.zeros((b,), jnp.int32))
    idx, _, _ = jax.lax.fori_loop(0, npoint, body, init)
    # TODO(synk): at realistic N this sequential argmax loop dominates end-to-end time
    # and would deserve its own Pallas pass; fine at the sizes exercised here.
    return idx


def ball_query_and_group(xyz, new_xyz, features, radius, nsample):
    """QueryAndGroup(use_xyz=True) semantics, emitted channels-first.

    Returns idx_cnt (B, npoint) and grouped (3+C, B*npoint, nsample) — already in the
    channels-first, points-then-neighbour order the Pallas kernel wrapper consumes,
    so no transpose of the channels-last nsample-amplified tensor is needed.
    """
    b, n, _ = xyz.shape
    npoint = new_xyz.shape[1]
    c = features.shape[1]

    diff = new_xyz[:, :, None, :] - xyz[:, None, :, :]          # (B, np, N, 3)
    dist2 = jnp.sum(diff * diff, axis=-1)                       # (B, np, N)
    within = dist2 < (radius * radius)

    cnt = jnp.minimum(jnp.sum(within, axis=-1), nsample).astype(jnp.int32)
    csum = jnp.cumsum(within.astype(jnp.int32), axis=-1)        # inclusive valid count
    slots = jnp.arange(nsample, dtype=jnp.int32)
    # sel[..., s] = index of the (s+1)-th in-radius point = #{j : csum_j <= s}
    sel = jnp.sum((csum[:, :, None, :] <= slots[None, None, :, None]).astype(jnp.int32),
                  axis=-1)                                       # (B, np, nsample)
    first = jnp.where(cnt > 0, sel[..., 0], 0)
    idx = jnp.where(slots[None, None, :] < cnt[..., None], sel, first[..., None])
    idx = idx.astype(jnp.int32)                                  # (B, np, nsample)

    # Channels-first gathers (no big channels-last intermediate).
    idx_flat = idx.reshape(b, 1, npoint * nsample)
    xyz_cf = jnp.transpose(xyz, (0, 2, 1))                       # (B, 3, N)
    g_xyz = jnp.take_along_axis(
        xyz_cf, jnp.broadcast_to(idx_flat, (b, 3, npoint * nsample)), axis=2)
    g_xyz = g_xyz.reshape(b, 3, npoint, nsample) \
        - jnp.transpose(new_xyz, (0, 2, 1))[..., None]           # (B, 3, np, ns)
    g_feat = jnp.take_along_axis(
        features, jnp.broadcast_to(idx_flat, (b, c, npoint * nsample)), axis=2)
    g_feat = g_feat.reshape(b, c, npoint, nsample)               # (B, C, np, ns)

    grouped = jnp.concatenate([g_xyz, g_feat], axis=1)           # (B, 3+C, np, ns)
    grouped_cmk = jnp.transpose(grouped, (1, 0, 2, 3)).reshape(3 + c, b * npoint, nsample)
    return cnt, grouped_cmk


# ---------------------------------------------------------------------------
# Module forward
# ---------------------------------------------------------------------------
def pointnet_sa_forward(xyz, features, params, *, npoint, radius, nsample):
    """
    xyz:      (B, N, 3)
    features: (B, C, N)
    returns   (new_xyz (B, npoint, 3), new_features (B, Cout, npoint), None, None)
    """
    b, n, _ = xyz.shape

    # sample_range_list default [[0, -1]] -> python slice [0:-1], method 'd-fps'.
    xyz_slice = xyz[:, 0:-1, :]
    sample_idx = furthest_point_sample(xyz_slice, npoint)              # (B, npoint)
    new_xyz = jnp.take_along_axis(xyz, sample_idx[..., None], axis=1)  # (B, npoint, 3)
    # TODO(synk): reference calls torch.save(new_xyz, <path>) here — file I/O dropped.

    idx_cnt, grouped_cmk = ball_query_and_group(xyz, new_xyz, features, radius, nsample)

    m = b * npoint
    cout = params[2].shape[0]
    mask = (idx_cnt > 0).astype(jnp.float32).reshape(1, m)

    w1, b1, w2, b2 = params
    pooled = grouped_mlp_maxpool(grouped_cmk, mask, w1, b1, w2, b2)    # (Cout, M) bf16
    new_features = (pooled.astype(jnp.float32)
                    .reshape(cout, b, npoint).transpose(1, 0, 2))      # (B, Cout, npoint)

    # skip_connection=False, aggregation_mlp / confidence_mlp / boundary_mlp are None
    # in the base class, so new_scores / new_scores1 stay None.
    # TODO(synk): boundary.boundary_grouping + torch.var branch uses an external CUDA op
    # and torch.randn, and only feeds boundary_mlp (None here) — not implemented.
    return new_xyz, new_features, None, None


def _reference_mlp_pool(grouped_cmk, mask, w1, b1, w2, b2, compute_dtype=jnp.bfloat16):
    """Plain-JAX reference that masks BEFORE pooling, like the PyTorch module."""
    cin, m, ns = grouped_cmk.shape
    x = grouped_cmk.astype(compute_dtype)
    h = jnp.einsum('hc,cmk->hmk', w1.astype(compute_dtype), x,
                   preferred_element_type=jnp.float32) + b1.reshape(-1, 1, 1)
    h = jnp.maximum(h, 0.0)
    y = jnp.einsum('oh,hmk->omk', w2.astype(compute_dtype), h.astype(compute_dtype),
                   preferred_element_type=jnp.float32) + b2.reshape(-1, 1, 1)
    y = jnp.maximum(y, 0.0)
    y = y * mask.reshape(1, m, 1)          # mask before max-pool (reference ordering)
    return jnp.max(y, axis=-1)             # (Cout, M)


if __name__ == "__main__":
    B, N, C = 2, 64, 4
    NPOINT, NSAMPLE, RADIUS = 16, 8, 0.3
    CIN, H, COUT = 3 + C, 32, 32

    key = jax.random.PRNGKey(0)
    k_xyz, k_feat, k1, k2, k3, k4 = jax.random.split(key, 6)

    xyz = jax.random.uniform(k_xyz, (B, N, 3), dtype=jnp.float32)
    features = jax.random.normal(k_feat, (B, C, N), dtype=jnp.float32)

    # Deterministic synthetic MLP weights (Conv2d 1x1 kernels, BN folded to identity),
    # stored channels-first like the PyTorch Conv2d weight (out, in).
    w1 = jax.random.normal(k1, (H, CIN), dtype=jnp.float32) * 0.2
    b1 = jax.random.normal(k2, (H,), dtype=jnp.float32) * 0.02
    w2 = jax.random.normal(k3, (COUT, H), dtype=jnp.float32) * 0.2
    b2 = jax.random.normal(k4, (COUT,), dtype=jnp.float32) * 0.02
    params = (w1, b1, w2, b2)

    new_xyz, new_features, new_scores, new_scores1 = pointnet_sa_forward(
        xyz, features, params, npoint=NPOINT, radius=RADIUS, nsample=NSAMPLE)
    jax.block_until_ready(new_features)

    assert new_xyz.shape == (B, NPOINT, 3)
    assert new_features.shape == (B, COUT, NPOINT)
    assert new_scores is None and new_scores1 is None

    # Sanity check of the Pallas hot path against a plain-JAX f32-stored reference that
    # masks before pooling (validates the bias-fold / pool-then-bias-ReLU / bf16-output
    # optimisations in the kernel).
    idx_cnt, grouped_cmk = ball_query_and_group(xyz, new_xyz, features, RADIUS, NSAMPLE)
    m = B * NPOINT
    mask = (idx_cnt > 0).astype(jnp.float32).reshape(1, m)
    got = grouped_mlp_maxpool(grouped_cmk, mask, w1, b1, w2, b2).astype(jnp.float32)
    ref = _reference_mlp_pool(grouped_cmk, mask, w1, b1, w2, b2)
    jax.block_until_ready((got, ref))
    assert got.shape == ref.shape
    assert jnp.allclose(got, ref, atol=2e-2, rtol=2e-2), "Pallas kernel mismatch"

    print("KERNEL_OK")
</pallas_src>

<mosaic_0001>
module attributes {stable_mosaic.version = 11 : i64} {
  func.func @_grouped_mlp_pool_kernel(%arg0: i32, %arg1: memref<8x1024xbf16, #tpu.memory_space<vmem>>, %arg2: memref<1x128xf32, #tpu.memory_space<vmem>>, %arg3: memref<32x8xbf16, #tpu.memory_space<vmem>>, %arg4: memref<32x32xbf16, #tpu.memory_space<vmem>>, %arg5: memref<32x1xf32, #tpu.memory_space<vmem>>, %arg6: memref<32x128xbf16, #tpu.memory_space<vmem>>) attributes {dimension_semantics = [#tpu.dimension_semantics<parallel>], iteration_bounds = array<i64: 1>, scalar_prefetch = 0 : i64, scratch_operands = 0 : i64, tpu.core_type = #tpu.core_type<tc>, window_params = [{transform_indices = @transform_0, window_bounds = array<i64: 8, 1024>}, {transform_indices = @transform_1, window_bounds = array<i64: 1, 128>}, {pipeline_mode = #tpu.pipeline_mode<synchronous>, transform_indices = @transform_2, window_bounds = array<i64: 32, 8>}, {pipeline_mode = #tpu.pipeline_mode<synchronous>, transform_indices = @transform_3, window_bounds = array<i64: 32, 32>}, {pipeline_mode = #tpu.pipeline_mode<synchronous>, transform_indices = @transform_4, window_bounds = array<i64: 32, 1>}, {transform_indices = @transform_5, window_bounds = array<i64: 32, 128>}]} {
    %c0 = arith.constant 0 : index
    %c0_0 = arith.constant 0 : index
    %0 = vector.load %arg3[%c0, %c0_0] : memref<32x8xbf16, #tpu.memory_space<vmem>>, vector<32x8xbf16>
    %c0_1 = arith.constant 0 : index
    %c0_2 = arith.constant 0 : index
    %1 = vector.load %arg1[%c0_1, %c0_2] : memref<8x1024xbf16, #tpu.memory_space<vmem>>, vector<8x1024xbf16>
    %cst = arith.constant dense<0.000000e+00> : vector<32x1024xf32>
    %2 = tpu.matmul %0, %1, %cst {dimension_numbers = #tpu.dot_dimension_numbers<[1], [0], [0], [1], [0, 0, 1, 1], [], []>} : vector<32x8xbf16>, vector<8x1024xbf16>, vector<32x1024xf32> -> vector<32x1024xf32>
    %cst_3 = arith.constant 0.000000e+00 : f32
    %3 = vector.broadcast %cst_3 : f32 to vector<32x1024xf32>
    %4 = arith.maximumf %2, %3 : vector<32x1024xf32>
    %5 = arith.truncf %4 : vector<32x1024xf32> to vector<32x1024xbf16>
    %c0_4 = arith.constant 0 : index
    %c0_5 = arith.constant 0 : index
    %6 = vector.load %arg4[%c0_4, %c0_5] : memref<32x32xbf16, #tpu.memory_space<vmem>>, vector<32x32xbf16>
    %cst_6 = arith.constant dense<0.000000e+00> : vector<32x1024xf32>
    %7 = tpu.matmul %6, %5, %cst_6 {dimension_numbers = #tpu.dot_dimension_numbers<[1], [0], [0], [1], [0, 0, 1, 1], [], []>} : vector<32x32xbf16>, vector<32x1024xbf16>, vector<32x1024xf32> -> vector<32x1024xf32>
    %8 = vector.extract_strided_slice %7 {offsets = [0, 0], sizes = [32, 128], strides = [1, 1]} : vector<32x1024xf32> to vector<32x128xf32>
    %9 = vector.extract_strided_slice %7 {offsets = [0, 128], sizes = [32, 128], strides = [1, 1]} : vector<32x1024xf32> to vector<32x128xf32>
    %10 = arith.maximumf %8, %9 : vector<32x128xf32>
    %11 = vector.extract_strided_slice %7 {offsets = [0, 256], sizes = [32, 128], strides = [1, 1]} : vector<32x1024xf32> to vector<32x128xf32>
    %12 = arith.maximumf %10, %11 : vector<32x128xf32>
    %13 = vector.extract_strided_slice %7 {offsets = [0, 384], sizes = [32, 128], strides = [1, 1]} : vector<32x1024xf32> to vector<32x128xf32>
    %14 = arith.maximumf %12, %13 : vector<32x128xf32>
    %15 = vector.extract_strided_slice %7 {offsets = [0, 512], sizes = [32, 128], strides = [1, 1]} : vector<32x1024xf32> to vector<32x128xf32>
    %16 = arith.maximumf %14, %15 : vector<32x128xf32>
    %17 = vector.extract_strided_slice %7 {offsets = [0, 640], sizes = [32, 128], strides = [1, 1]} : vector<32x1024xf32> to vector<32x128xf32>
    %18 = arith.maximumf %16, %17 : vector<32x128xf32>
    %19 = vector.extract_strided_slice %7 {offsets = [0, 768], sizes = [32, 128], strides = [1, 1]} : vector<32x1024xf32> to vector<32x128xf32>
    %20 = arith.maximumf %18, %19 : vector<32x128xf32>
    %21 = vector.extract_strided_slice %7 {offsets = [0, 896], sizes = [32, 128], strides = [1, 1]} : vector<32x1024xf32> to vector<32x128xf32>
    %22 = arith.maximumf %20, %21 : vector<32x128xf32>
    %c0_7 = arith.constant 0 : index
    %c0_8 = arith.constant 0 : index
    %23 = vector.load %arg5[%c0_7, %c0_8] : memref<32x1xf32, #tpu.memory_space<vmem>>, vector<32x1xf32>
    %24 = vector.broadcast %23 : vector<32x1xf32> to vector<32x128xf32>
    %25 = arith.addf %22, %24 : vector<32x128xf32>
    %cst_9 = arith.constant 0.000000e+00 : f32
    %26 = vector.broadcast %cst_9 : f32 to vector<32x128xf32>
    %27 = arith.maximumf %25, %26 : vector<32x128xf32>
    %c0_10 = arith.constant 0 : index
    %c0_11 = arith.constant 0 : index
    %28 = vector.load %arg2[%c0_10, %c0_11] : memref<1x128xf32, #tpu.memory_space<vmem>>, vector<1x128xf32>
    %29 = vector.broadcast %28 : vector<1x128xf32> to vector<32x128xf32>
    %30 = arith.mulf %27, %29 : vector<32x128xf32>
    %31 = arith.truncf %30 : vector<32x128xf32> to vector<32x128xbf16>
    %c0_12 = arith.constant 0 : index
    %c0_13 = arith.constant 0 : index
    %32 = vector.load %arg6[%c0_12, %c0_13] : memref<32x128xbf16, #tpu.memory_space<vmem>>, vector<32x128xbf16>
    tpu.vector_store %arg6[%c0_12, %c0_13], %31 {strides = array<i32>} : memref<32x128xbf16, #tpu.memory_space<vmem>>, vector<32x128xbf16>,
    return
  }
  func.func @transform_0(%arg0: i32) -> (i32, i32) {
    %c0_i32 = arith.constant 0 : i32
    %c0_i32_0 = arith.constant 0 : i32
    return %c0_i32, %arg0 : i32, i32
  }
  func.func @transform_1(%arg0: i32) -> (i32, i32) {
    %c0_i32 = arith.constant 0 : i32
    %c0_i32_0 = arith.constant 0 : i32
    return %c0_i32, %arg0 : i32, i32
  }
  func.func @transform_2(%arg0: i32) -> (i32, i32) {
    %c0_i32 = arith.constant 0 : i32
    %c0_i32_0 = arith.constant 0 : i32
    %c0_i32_1 = arith.constant 0 : i32
    return %c0_i32, %c0_i32_0 : i32, i32
  }
  func.func @transform_3(%arg0: i32) -> (i32, i32) {
    %c0_i32 = arith.constant 0 : i32
    %c0_i32_0 = arith.constant 0 : i32
    %c0_i32_1 = arith.constant 0 : i32
    return %c0_i32, %c0_i32_0 : i32, i32
  }
  func.func @transform_4(%arg0: i32) -> (i32, i32) {
    %c0_i32 = arith.constant 0 : i32
    %c0_i32_0 = arith.constant 0 : i32
    %c0_i32_1 = arith.constant 0 : i32
    return %c0_i32, %c0_i32_0 : i32, i32
  }
  func.func @transform_5(%arg0: i32) -> (i32, i32) {
    %c0_i32 = arith.constant 0 : i32
    %c0_i32_0 = arith.constant 0 : i32
    return %c0_i32, %arg0 : i32, i32
  }
}

</mosaic_0001>

<bundles_post_ra>
// kernel: tpu_custom_call.1
= control target key start
LH: loop header
LB: loop body
LE: loop exit
PB: predicated region body
PF: predicated region fallthrough
CT: control target
= control target key end

     0   :  { %vm67_vm0 = vcmask 1043456   ;;  %s787_s0 = inlined_call_operand.vmem [shape: bf16[8,1024], index: 0, kind: input, shape index: {}]   ;;  %s788_s1 = inlined_call_operand.vmem [shape: f32[1,128], index: 1, kind: input, shape index: {}]   ;;  %s789_s2 = inlined_call_operand.vmem [shape: bf16[32,8], index: 2, kind: input, shape index: {}]   ;;  %s790_s3 = inlined_call_operand.vmem [shape: bf16[32,32], index: 3, kind: input, shape index: {}]   ;;  %s791_s4 = inlined_call_operand.vmem [shape: f32[32,1], index: 4, kind: input, shape index: {}]   ;;  %s792_s5 = inlined_call_operand.hbm [shape: bf16[32,128], index: 5, kind: output, shape index: {}]  }
   0x1   :  { %v26_v0 = vld [vmem:[%s787_s0] sm:$0xff]  ;;  %v27_v1 = vld [vmem:[%s787_s0 + $0x8] sm:$0xff]  ;;  %v29_v6 = vld [vmem:[%s787_s0 + $0x18] sm:$0xff] }
   0x2   :  { %v44_v2 = vunpack.c.l.b16 %v26_v0  ;;  %v45_v3 = vunpack.c.h.b16 %v26_v0  ;;  %v46_v4 = vunpack.c.l.b16 %v27_v1  ;;  %v47_v5 = vunpack.c.h.b16 %v27_v1  ;;  %v28_v7 = vld [vmem:[%s787_s0 + $0x10] sm:$0xff] }
   0x3   :  { %v50_v8 = vunpack.c.l.b16 %v29_v6  ;;  %v51_v9 = vunpack.c.h.b16 %v29_v6  ;;  %v48_v10 = vunpack.c.l.b16 %v28_v7  ;;  %v49_v11 = vunpack.c.h.b16 %v28_v7 }
   0x4   :  { %10 = vsyncpa [#allocation3], 0  ;;  %v52_v12 = vpack.c.b16 %v44_v2, %v44_v2  ;;  %v53_v13 = vpack.c.b16 %v45_v3, %v45_v3  ;;  %v54_v14 = vpack.c.b16 %v46_v4, %v46_v4  ;;  %v55_v15 = vpack.c.b16 %v47_v5, %v47_v5  ;;  %v607_v24 = vld [vmem:[%s789_s2] sm:$0xff]  ;;  %v608_v29 = vld [vmem:[%s789_s2 + $0x8] sm:$0xff]  ;;  %s547_s18 = sshll.u32 %s792_s5, 4  ;;  %s657_s19 = smov 64   ;;  %s548_s18 = int_to_ptr.hbm [resolvable:$true] %s547_s18 }
   0x5   :  { %v58_v16 = vpack.c.b16 %v50_v8, %v50_v8  ;;  %v59_v17 = vpack.c.b16 %v51_v9, %v51_v9  ;;  %v56_v18 = vpack.c.b16 %v48_v10, %v48_v10  ;;  %v57_v19 = vpack.c.b16 %v49_v11, %v49_v11  ;;  %v734_v0 = vld [vmem:[%s790_s3] sm:$0xff]  ;;  %s658_s20 = smov 4  }
   0x6   :  { %v69_v20 = vsel %vm67_vm0, %v52_v12, 0  ;;  %v72_v21 = vsel %vm67_vm0, %v53_v13, 0  ;;  %v75_v22 = vsel %vm67_vm0, %v54_v14, 0  ;;  %v78_v23 = vsel %vm67_vm0, %v55_v15, 0 }
   0x7   :  { %99 = vmatpush.bf16.msra.mxu0 %v69_v20  ;;  %118 = vmatpush.bf16.msra.mxu1 %v72_v21  ;;  %vm60_vm1 = vcmask 64512   ;;  %v87_v25 = vsel %vm67_vm0, %v58_v16, 0  ;;  %v90_v26 = vsel %vm67_vm0, %v59_v17, 0  ;;  %v81_v27 = vsel %vm67_vm0, %v56_v18, 0  ;;  %v610_v17 = vld [vmem:[%s790_s3 + $0x8] sm:$0xff] }
   0x8   :  { %137 = vmatpush.bf16.msra.mxu2 %v75_v22  ;;  %156 = vmatpush.bf16.msra.mxu3 %v78_v23  ;;  %v84_v28 = vsel %vm67_vm0, %v57_v19, 0  ;;  %vm306_vm2 = vcmask 261120  }
   0xa   :  { %567 = vmatmul.msk.bf16.vlgmr.msra.gmra.mxu0 %vm60_vm1, %v607_v24  ;;  %569 = vmatmul.msk.bf16.vlgmr.msra.gmra.mxu1 %vm60_vm1, %v607_v24 }
   0xb   :  { %571 = vmatmul.msk.bf16.vlgmr.msra.gmra.mxu2 %vm60_vm1, %v607_v24  ;;  %573 = vmatmul.msk.bf16.vlgmr.msra.gmra.mxu3 %vm60_vm1, %v607_v24 }
   0xc   :  { %213 = vmatpush.bf16.msrb.mxu2 %v87_v25  ;;  %232 = vmatpush.bf16.msrb.mxu3 %v90_v26 }
   0xd   :  { %175 = vmatpush.bf16.msrb.mxu0 %v81_v27  ;;  %194 = vmatpush.bf16.msrb.mxu1 %v84_v28 }
  0x1a   :  { %568 = vmatmul.msk.bf16.gmra.mxu0 %vm60_vm1, %v608_v29  ;;  %570 = vmatmul.msk.bf16.gmra.mxu1 %vm60_vm1, %v608_v29 }
  0x1b   :  { %572 = vmatmul.msk.bf16.gmra.mxu2 %vm60_vm1, %v608_v29  ;;  %574 = vmatmul.msk.bf16.gmra.mxu3 %vm60_vm1, %v608_v29 }
  0x2a   :  { %575 = vmatmul.msk.bf16.vlgmr.msrb.gmra.mxu0 %vm60_vm1, %v607_v24  ;;  %577 = vmatmul.msk.bf16.vlgmr.msrb.gmra.mxu1 %vm60_vm1, %v607_v24 }
  0x2b   :  { %579 = vmatmul.msk.bf16.vlgmr.msrb.gmra.mxu2 %vm60_vm1, %v607_v24  ;;  %581 = vmatmul.msk.bf16.vlgmr.msrb.gmra.mxu3 %vm60_vm1, %v607_v24 }
  0x3a   :  { %576 = vmatmul.msk.bf16.gmra.mxu0 %vm60_vm1, %v608_v29  ;;  %578 = vmatmul.msk.bf16.gmra.mxu1 %vm60_vm1, %v608_v29 }
  0x3b   :  { %580 = vmatmul.msk.bf16.gmra.mxu2 %vm60_vm1, %v608_v29  ;;  %582 = vmatmul.msk.bf16.gmra.mxu3 %vm60_vm1, %v608_v29 }
  0x87   :  { %v101_v30 = vpop.f32.mrf.mxu0  ;;  %v120_v31 = vpop.f32.mrf.mxu1 }
  0x88   :  { %v244_v48 = vmax.f32 %v101_v30, 0.0  ;;  %v245_v49 = vmax.f32 %v120_v31, 0.0 }
  0x8e   :  { %v139_v32 = vpop.f32.mrf.mxu2  ;;  %v158_v33 = vpop.f32.mrf.mxu3 }
  0x8f   :  { %v103_v34 = vpop.f32.mrf.mxu0  ;;  %v122_v35 = vpop.f32.mrf.mxu1  ;;  %v246_v5 = vmax.f32 %v139_v32, 0.0  ;;  %v247_v6 = vmax.f32 %v158_v33, 0.0  ;;  %v493_v32 = vld [vmem:[%s791_s4] sm:$0xff]  ;;  %v495_v33 = vld [vmem:[%s791_s4 + $0x10] sm:$0xff] }
  0x90   :  { %v252_v50 = vmax.f32 %v103_v34, 0.0  ;;  %v253_v51 = vmax.f32 %v122_v35, 0.0  ;;  %v655_v34 = vmov 0  }
  0x91   :  { %626 = vset.pattern.permute.xlu0 %v655_v34  ;;  %627 = vset.pattern.permute.xlu1 %v655_v34 }
  0x92   :  { %v276_v54 = vpack.c.bf16 %v252_v50, %v244_v48  ;;  %v277_v55 = vpack.c.bf16 %v253_v51, %v245_v49  ;;  %499 = vperm.xlu0 %626, %v493_v32   ;;  %509 = vperm.xlu1 %627, %v495_v33   ;;  %v496_v48 = vld [vmem:[%s791_s4 + $0x18] sm:$0xff] }
  0x96   :  { %v141_v36 = vpop.f32.mrf.mxu2  ;;  %v160_v37 = vpop.f32.mrf.mxu3 }
  0x97   :  { %v106_v38 = vpop.f32.mrf.mxu0  ;;  %v125_v39 = vpop.f32.mrf.mxu1  ;;  %v254_v1 = vmax.f32 %v141_v36, 0.0  ;;  %v255_v2 = vmax.f32 %v160_v37, 0.0 }
  0x98   :  { %v260_v40 = vmax.f32 %v106_v38, 0.0  ;;  %v261_v41 = vmax.f32 %v125_v39, 0.0 }
  0x99   :  { %v278_v7 = vpack.c.bf16 %v254_v1, %v246_v5  ;;  %v279_v8 = vpack.c.bf16 %v255_v2, %v247_v6 }
  0x9a   :  { %514 = vperm.xlu1 %627, %v496_v48  }
  0x9e   :  { %v144_v42 = vpop.f32.mrf.mxu2  ;;  %v163_v43 = vpop.f32.mrf.mxu3 }
  0x9f   :  { %v108_v44 = vpop.f32.mrf.mxu0  ;;  %v127_v45 = vpop.f32.mrf.mxu1  ;;  %v262_v58 = vmax.f32 %v144_v42, 0.0  ;;  %v263_v59 = vmax.f32 %v163_v43, 0.0 }
  0xa0   :  { %v268_v46 = vmax.f32 %v108_v44, 0.0  ;;  %v269_v47 = vmax.f32 %v127_v45, 0.0 }
  0xa2   :  { %v284_v52 = vpack.c.bf16 %v268_v46, %v260_v40  ;;  %v285_v53 = vpack.c.bf16 %v269_v47, %v261_v41  ;;  %v494_v47 = vld [vmem:[%s791_s4 + $0x8] sm:$0xff] }
  0xa3   :  { %504 = vperm.xlu0 %626, %v494_v47  }
  0xa4   :  { %319 = vmatpush.bf16.msra.mxu0 %v284_v52  ;;  %338 = vmatpush.bf16.msra.mxu1 %v285_v53 }
  0xa6   :  { %v146_v56 = vpop.f32.mrf.mxu2  ;;  %v165_v57 = vpop.f32.mrf.mxu3 }
  0xa7   :  { %v270_v60 = vmax.f32 %v146_v56, 0.0  ;;  %v271_v61 = vmax.f32 %v165_v57, 0.0  ;;  %v177_v62 = vpop.f32.mrf.mxu0  ;;  %v196_v63 = vpop.f32.mrf.mxu1 }
  0xa8   :  { %320 = vmatpush.bf16.msra.mxu0 %v276_v54  ;;  %339 = vmatpush.bf16.msra.mxu1 %v277_v55  ;;  %v248_v26 = vmax.f32 %v177_v62, 0.0  ;;  %v249_v27 = vmax.f32 %v196_v63, 0.0 }
  0xa9   :  { %v286_v3 = vpack.c.bf16 %v270_v60, %v262_v58  ;;  %v287_v4 = vpack.c.bf16 %v271_v61, %v263_v59 }
  0xab   :  { %357 = vmatpush.bf16.msra.mxu2 %v286_v3  ;;  %376 = vmatpush.bf16.msra.mxu3 %v287_v4 }
  0xac   :  { %591 = vmatmul.msk.bf16.vlgmr.msra.gmra.mxu0 %vm306_vm2, %v734_v0  ;;  %593 = vmatmul.msk.bf16.vlgmr.msra.gmra.mxu1 %vm306_vm2, %v734_v0 }
  0xae   :  { %v740_v9 = vpop.f32.mrf.mxu2  ;;  %v742_v10 = vpop.f32.mrf.mxu3 }
  0xaf   :  { %358 = vmatpush.bf16.msra.mxu2 %v278_v7  ;;  %377 = vmatpush.bf16.msra.mxu3 %v279_v8  ;;  %v179_v11 = vpop.f32.mrf.mxu0  ;;  %v198_v12 = vpop.f32.mrf.mxu1  ;;  %v250_v49 = vmax.f32 %v740_v9, 0.0  ;;  %v251_v50 = vmax.f32 %v742_v10, 0.0 }
  0xb0   :  { %v256_v28 = vmax.f32 %v179_v11, 0.0  ;;  %v257_v29 = vmax.f32 %v198_v12, 0.0 }
  0xb2   :  { %595 = vmatmul.msk.bf16.vlgmr.msra.gmra.mxu2 %vm306_vm2, %v734_v0  ;;  %597 = vmatmul.msk.bf16.vlgmr.msra.gmra.mxu3 %vm306_vm2, %v734_v0  ;;  %v280_v35 = vpack.c.bf16 %v256_v28, %v248_v26  ;;  %v281_v36 = vpack.c.bf16 %v257_v29, %v249_v27 }
  0xb6   :  { %v217_v13 = vpop.f32.mrf.mxu2  ;;  %v236_v14 = vpop.f32.mrf.mxu3 }
  0xb7   :  { %v182_v15 = vpop.f32.mrf.mxu0  ;;  %v201_v16 = vpop.f32.mrf.mxu1  ;;  %v258_v43 = vmax.f32 %v217_v13, 0.0  ;;  %v259_v44 = vmax.f32 %v236_v14, 0.0 }
  0xb8   :  { %v264_v18 = vmax.f32 %v182_v15, 0.0  ;;  %v265_v19 = vmax.f32 %v201_v16, 0.0 }
  0xb9   :  { %v282_v51 = vpack.c.bf16 %v258_v43, %v250_v49  ;;  %v283_v52 = vpack.c.bf16 %v259_v44, %v251_v50 }
  0xbc   :  { %592 = vmatmul.msk.bf16.gmra.mxu0 %vm306_vm2, %v610_v17  ;;  %594 = vmatmul.msk.bf16.gmra.mxu1 %vm306_vm2, %v610_v17 }
  0xbe   :  { %v220_v20 = vpop.f32.mrf.mxu2  ;;  %v239_v21 = vpop.f32.mrf.mxu3 }
  0xbf   :  { %v184_v22 = vpop.f32.mrf.mxu0  ;;  %v203_v23 = vpop.f32.mrf.mxu1  ;;  %v266_v39 = vmax.f32 %v220_v20, 0.0  ;;  %v267_v40 = vmax.f32 %v239_v21, 0.0 }
  0xc0   :  { %v272_v24 = vmax.f32 %v184_v22, 0.0  ;;  %v273_v25 = vmax.f32 %v203_v23, 0.0 }
  0xc2   :  { %v288_v30 = vpack.c.bf16 %v272_v24, %v264_v18  ;;  %v289_v31 = vpack.c.bf16 %v273_v25, %v265_v19  ;;  %596 = vmatmul.msk.bf16.gmra.mxu2 %vm306_vm2, %v610_v17  ;;  %598 = vmatmul.msk.bf16.gmra.mxu3 %vm306_vm2, %v610_v17 }
  0xc4   :  { %395 = vmatpush.bf16.msrb.mxu0 %v288_v30  ;;  %414 = vmatpush.bf16.msrb.mxu1 %v289_v31 }
  0xc6   :  { %v222_v37 = vpop.f32.mrf.mxu2  ;;  %v241_v38 = vpop.f32.mrf.mxu3 }
  0xc7   :  { %v274_v41 = vmax.f32 %v222_v37, 0.0  ;;  %v275_v42 = vmax.f32 %v241_v38, 0.0  ;;  %v628_v38 = vld [vmem:[%s788_s1] ss:$0 sm:$0xff]  ;;  %s656_s1 = smov [#allocation2]  }
  0xc8   :  { %396 = vmatpush.bf16.msrb.mxu0 %v280_v35  ;;  %415 = vmatpush.bf16.msrb.mxu1 %v281_v36  ;;  %s545_s15 = sshll.u32 %s656_s1, 4  ;;  %s546_s15 = int_to_ptr.vmem [resolvable:$true] %s545_s15 }
  0xc9   :  { %v290_v45 = vpack.c.bf16 %v274_v41, %v266_v39  ;;  %v291_v46 = vpack.c.bf16 %v275_v42, %v267_v40 }
  0xcb   :  { %433 = vmatpush.bf16.msrb.mxu2 %v290_v45  ;;  %452 = vmatpush.bf16.msrb.mxu3 %v291_v46 }
  0xcc   :  { %599 = vmatmul.msk.bf16.vlgmr.msrb.gmra.mxu0 %vm306_vm2, %v734_v0  ;;  %601 = vmatmul.msk.bf16.vlgmr.msrb.gmra.mxu1 %vm306_vm2, %v734_v0 }
  0xcf   :  { %434 = vmatpush.bf16.msrb.mxu2 %v282_v51  ;;  %453 = vmatpush.bf16.msrb.mxu3 %v283_v52 }
  0xd2   :  { %603 = vmatmul.msk.bf16.vlgmr.msrb.gmra.mxu2 %vm306_vm2, %v734_v0  ;;  %605 = vmatmul.msk.bf16.vlgmr.msrb.gmra.mxu3 %vm306_vm2, %v734_v0 }
  0xdc   :  { %600 = vmatmul.msk.bf16.gmra.mxu0 %vm306_vm2, %v610_v17  ;;  %602 = vmatmul.msk.bf16.gmra.mxu1 %vm306_vm2, %v610_v17 }
  0xe2   :  { %604 = vmatmul.msk.bf16.gmra.mxu2 %vm306_vm2, %v610_v17  ;;  %606 = vmatmul.msk.bf16.gmra.mxu3 %vm306_vm2, %v610_v17 }
 0x104   :  { %v500_v16 = vpop.permute.xlu0 %499  ;;  %v510_v50 = vpop.permute.xlu1 %509 }
 0x115   :  { %v505_v33 = vpop.permute.xlu0 %504 }
 0x129   :  { %v322_v53 = vpop.f32.mrf.mxu0  ;;  %v341_v54 = vpop.f32.mrf.mxu1 }
 0x12a   :  { %v465_v3 = vmax.f32 %v322_v53, %v341_v54 }
 0x131   :  { %v324_v55 = vpop.f32.mrf.mxu0  ;;  %v343_v56 = vpop.f32.mrf.mxu1 }
 0x132   :  { %v466_v10 = vmax.f32 %v324_v55, %v343_v56 }
 0x135   :  { %v360_v57 = vpop.f32.mrf.mxu2  ;;  %v379_v58 = vpop.f32.mrf.mxu3 }
 0x136   :  { %v469_v5 = vmax.f32 %v465_v3, %v360_v57 }
 0x138   :  { %v473_v9 = vmax.f32 %v469_v5, %v379_v58 }
 0x139   :  { %v327_v59 = vpop.f32.mrf.mxu0  ;;  %v346_v60 = vpop.f32.mrf.mxu1 }
 0x13a   :  { %v467_v21 = vmax.f32 %v327_v59, %v346_v60 }
 0x13d   :  { %v362_v61 = vpop.f32.mrf.mxu2  ;;  %v381_v62 = vpop.f32.mrf.mxu3 }
 0x13e   :  { %v470_v13 = vmax.f32 %v466_v10, %v362_v61  ;;  %v515_v61 = vpop.permute.xlu1 %514 }
 0x140   :  { %v474_v19 = vmax.f32 %v470_v13, %v381_v62 }
 0x141   :  { %v329_v63 = vpop.f32.mrf.mxu0  ;;  %v348_v0 = vpop.f32.mrf.mxu1 }
 0x142   :  { %v468_v34 = vmax.f32 %v329_v63, %v348_v0 }
 0x145   :  { %v365_v1 = vpop.f32.mrf.mxu2  ;;  %v384_v2 = vpop.f32.mrf.mxu3 }
 0x146   :  { %v471_v23 = vmax.f32 %v467_v21, %v365_v1 }
 0x148   :  { %v475_v29 = vmax.f32 %v471_v23, %v384_v2 }
 0x149   :  { %v398_v4 = vpop.f32.mrf.mxu0  ;;  %v417_v6 = vpop.f32.mrf.mxu1 }
 0x14a   :  { %v477_v11 = vmax.f32 %v473_v9, %v398_v4 }
 0x14c   :  { %v481_v14 = vmax.f32 %v477_v11, %v417_v6 }
 0x14d   :  { %v367_v7 = vpop.f32.mrf.mxu2  ;;  %v386_v8 = vpop.f32.mrf.mxu3 }
 0x14e   :  { %v472_v37 = vmax.f32 %v468_v34, %v367_v7 }
 0x150   :  { %v476_v46 = vmax.f32 %v472_v37, %v386_v8 }
 0x151   :  { %v400_v12 = vpop.f32.mrf.mxu0  ;;  %v419_v15 = vpop.f32.mrf.mxu1 }
 0x152   :  { %v478_v22 = vmax.f32 %v474_v19, %v400_v12 }
 0x154   :  { %v482_v26 = vmax.f32 %v478_v22, %v419_v15 }
 0x155   :  { %v436_v17 = vpop.f32.mrf.mxu2  ;;  %v455_v18 = vpop.f32.mrf.mxu3 }
 0x156   :  { %v485_v20 = vmax.f32 %v481_v14, %v436_v17 }
 0x158   :  { %v489_v24 = vmax.f32 %v485_v20, %v455_v18 }
 0x159   :  { %v403_v25 = vpop.f32.mrf.mxu0  ;;  %v422_v32 = vpop.f32.mrf.mxu1 }
 0x15a   :  { %v517_v30 = vadd.f32 %v500_v16, %v489_v24  ;;  %v479_v35 = vmax.f32 %v475_v29, %v403_v25 }
 0x15c   :  { %v521_v39 = vmax.f32 %v517_v30, 0.0  ;;  %v483_v41 = vmax.f32 %v479_v35, %v422_v32 }
 0x15d   :  { %v438_v27 = vpop.f32.mrf.mxu2  ;;  %v457_v28 = vpop.f32.mrf.mxu3 }
 0x15e   :  { %v486_v31 = vmax.f32 %v482_v26, %v438_v27  ;;  %v529_v47 = vmul.f32 %v628_v38, %v521_v39 }
 0x160   :  { %v490_v36 = vmax.f32 %v486_v31, %v457_v28 }
 0x161   :  { %v405_v43 = vpop.f32.mrf.mxu0  ;;  %v424_v53 = vpop.f32.mrf.mxu1 }
 0x162   :  { %v518_v40 = vadd.f32 %v505_v33, %v490_v36  ;;  %v480_v52 = vmax.f32 %v476_v46, %v405_v43 }
 0x164   :  { %v522_v42 = vmax.f32 %v518_v40, 0.0  ;;  %v484_v55 = vmax.f32 %v480_v52, %v424_v53 }
 0x165   :  { %v441_v44 = vpop.f32.mrf.mxu2  ;;  %v460_v45 = vpop.f32.mrf.mxu3 }
 0x166   :  { %v530_v48 = vmul.f32 %v628_v38, %v522_v42  ;;  %v487_v49 = vmax.f32 %v483_v41, %v441_v44 }
 0x168   :  { %v614_v51 = vpack.c.bf16 %v530_v48, %v529_v47  ;;  %v491_v54 = vmax.f32 %v487_v49, %v460_v45 }
 0x16a   :  { %615 = vst [vmem:[#allocation2] sm:$0xff] %v614_v51   ;;  %v519_v57 = vadd.f32 %v510_v50, %v491_v54 }
 0x16c   :  { %v523_v62 = vmax.f32 %v519_v57, 0.0 }
 0x16d   :  { %v443_v56 = vpop.f32.mrf.mxu2  ;;  %v462_v59 = vpop.f32.mrf.mxu3 }
 0x16e   :  { %v488_v58 = vmax.f32 %v484_v55, %v443_v56  ;;  %v531_v1 = vmul.f32 %v628_v38, %v523_v62 }
 0x170   :  { %v492_v60 = vmax.f32 %v488_v58, %v462_v59 }
 0x172   :  { %v520_v63 = vadd.f32 %v515_v61, %v492_v60 }
 0x174   :  { %v524_v0 = vmax.f32 %v520_v63, 0.0 }
 0x176   :  { %v532_v2 = vmul.f32 %v628_v38, %v524_v0 }
 0x178   :  { %v619_v3 = vpack.c.bf16 %v532_v2, %v531_v1 }
 0x17a   :  { %621 = vst [vmem:[#allocation2 + $0x8] sm:$0xff] %v619_v3  }
 0x17b   :  { %553 = dma.vmem_to_hbm [thread:$0]  %s546_s15, 256, %s548_s18, [#allocation3], %s657_s19, %s657_s19, %s658_s20  }
 0x17c   :  { %653 = dma.done.wait [#allocation3], 256  }
 0x17d   :  { %654 = vsyncadd [#allocation3], 4294967040 }
 0x17e   :  { %558 = vsyncpa [#allocation3], 1 }

</bundles_post_ra>
